<compile_context>
chip_gen: v7x
topology: tpu7x:2x2x1
jax: 0.10.0
libtpu: 0.0.40
codegen_flags: <defaults>
</compile_context>

<pallas_src>
import functools

import jax
import jax.numpy as jnp
from jax.experimental import pallas as pl
from jax.experimental.pallas import tpu as pltpu

MARGIN = 0.5
EPS = 1e-6  # matches torch.nn.PairwiseDistance default


def _contrastive_loss_kernel(text_ref, kw_ref, label_ref, out_ref, acc_ref,
                             *, total_rows, margin):
    i = pl.program_id(0)

    @pl.when(i == 0)
    def _():
        acc_ref[...] = jnp.zeros_like(acc_ref)

    # Cast to f32 inside the kernel (inputs DMA'd in native dtype).
    t = text_ref[...].astype(jnp.float32)          # (TB, D)
    k = kw_ref[...].astype(jnp.float32)            # (TB, D)
    diff = (t - k) + EPS
    sq_dist = jnp.sum(diff * diff, axis=-1, keepdims=True)   # (TB, 1)
    dist = jnp.sqrt(sq_dist)                                  # EUP

    label = label_ref[...].astype(jnp.float32)                # (TB, 1)
    pos_term = (1.0 - label) * sq_dist                        # reuse sq_dist
    hinge = jnp.maximum(margin - dist, 0.0)
    neg_term = label * (hinge * hinge)
    per_row = pos_term + neg_term                             # (TB, 1)

    # Mask rows beyond the true batch size (last partial block).
    tb = per_row.shape[0]
    row = i * tb + jax.lax.broadcasted_iota(jnp.int32, (tb, 1), 0)
    per_row = jnp.where(row < total_rows, per_row, 0.0)

    acc_ref[...] += jnp.sum(per_row, axis=0, keepdims=True)   # (1, 1)

    @pl.when(i == pl.num_programs(0) - 1)
    def _():
        out_ref[...] = acc_ref[...] * (1.0 / float(total_rows))


def _choose_block_rows(batch, feat, itemsize, vmem_budget_bytes=24 << 20):
    # 2 embedding inputs x 2 pipeline buffers x (TB, feat) must fit the budget.
    max_rows = vmem_budget_bytes // max(1, 4 * feat * itemsize)
    tb = int(min(1024, max(8, max_rows)))
    tb = max(8, (tb // 8) * 8)
    b_pad = -(-batch // 8) * 8        # no point exceeding the (padded) batch
    return max(8, min(tb, b_pad))


def contrastive_loss(text_embedding, keyword_embedding, label, *,
                     margin=MARGIN, block_rows=None):
    """text/keyword embeddings: [B, D] (any float dtype); label: [B] -> scalar f32."""
    B, D = text_embedding.shape
    itemsize = jnp.dtype(text_embedding.dtype).itemsize
    tb = block_rows if block_rows is not None else _choose_block_rows(B, D, itemsize)
    tb = max(8, (int(tb) // 8) * 8)
    grid = (pl.cdiv(B, tb),)

    label2d = label.reshape(B, 1).astype(jnp.float32)

    kernel = functools.partial(
        _contrastive_loss_kernel, total_rows=B, margin=float(margin))

    cost = pl.CostEstimate(
        flops=5 * B * D,
        transcendentals=B,
        bytes_accessed=2 * B * D * itemsize + B * 4 + 4,
    )
    # Double-buffered input tiles + headroom; stays well under v7x's 64 MiB.
    vmem_limit = int(min(40 << 20, max(32 << 20, 4 * tb * D * itemsize + (4 << 20))))

    out = pl.pallas_call(
        kernel,
        out_shape=jax.ShapeDtypeStruct((1, 1), jnp.float32),
        grid_spec=pltpu.PrefetchScalarGridSpec(
            num_scalar_prefetch=0,
            grid=grid,
            in_specs=[
                pl.BlockSpec((tb, D), lambda i: (i, 0)),
                pl.BlockSpec((tb, D), lambda i: (i, 0)),
                pl.BlockSpec((tb, 1), lambda i: (i, 0)),
            ],
            out_specs=pl.BlockSpec((1, 1), lambda i: (0, 0)),
            scratch_shapes=[pltpu.VMEM((1, 1), jnp.float32)],
        ),
        compiler_params=pltpu.CompilerParams(
            dimension_semantics=("arbitrary",),
            vmem_limit_bytes=vmem_limit,
        ),
        cost_estimate=cost,
    )(text_embedding, keyword_embedding, label2d)
    return out[0, 0]


def _reference(text_embedding, keyword_embedding, label, margin=MARGIN):
    # Pure-JAX reference (PairwiseDistance(p=2, eps=1e-6) + contrastive loss).
    diff = (text_embedding.astype(jnp.float32)
            - keyword_embedding.astype(jnp.float32)) + EPS
    dist = jnp.sqrt(jnp.sum(diff * diff, axis=-1))
    loss = jnp.mean(
        (1.0 - label) * dist ** 2
        + label * jnp.maximum(margin - dist, 0.0) ** 2
    )
    return loss


if __name__ == "__main__":
    # Small shapes; B not a multiple of the block size to exercise masking and
    # a multi-step grid (block_rows=8 -> grid of 3 with a partial last block).
    B, D = 20, 32
    key = jax.random.PRNGKey(0)
    k1, k2, k3 = jax.random.split(key, 3)

    text_emb = jax.random.normal(k1, (B, D), dtype=jnp.float32)
    kw_emb = jax.random.normal(k2, (B, D), dtype=jnp.float32)
    label = jax.random.bernoulli(k3, p=0.5, shape=(B,)).astype(jnp.float32)

    # f32 path, multi-block grid.
    loss = contrastive_loss(text_emb, kw_emb, label, block_rows=8)
    jax.block_until_ready(loss)
    ref = _reference(text_emb, kw_emb, label)
    assert jnp.allclose(loss, ref, rtol=1e-4, atol=1e-5), (loss, ref)

    # bf16 path: native-dtype DMA, f32 math inside the kernel.
    text_bf = text_emb.astype(jnp.bfloat16)
    kw_bf = kw_emb.astype(jnp.bfloat16)
    loss_bf = contrastive_loss(text_bf, kw_bf, label)  # auto block size
    jax.block_until_ready(loss_bf)
    ref_bf = _reference(text_bf, kw_bf, label)
    assert jnp.allclose(loss_bf, ref_bf, rtol=1e-4, atol=1e-4), (loss_bf, ref_bf)

    print("KERNEL_OK")
</pallas_src>

<mosaic_0001>
module attributes {stable_mosaic.version = 11 : i64} {
  func.func @_contrastive_loss_kernel(%arg0: i32, %arg1: memref<8x32xf32, #tpu.memory_space<vmem>>, %arg2: memref<8x32xf32, #tpu.memory_space<vmem>>, %arg3: memref<8x1xf32, #tpu.memory_space<vmem>>, %arg4: memref<1x1xf32, #tpu.memory_space<vmem>>, %arg5: memref<1x1xf32, #tpu.memory_space<vmem>>) attributes {dimension_semantics = [#tpu.dimension_semantics<arbitrary>], iteration_bounds = array<i64: 3>, scalar_prefetch = 0 : i64, scratch_operands = 1 : i64, tpu.core_type = #tpu.core_type<tc>, window_params = [{transform_indices = @transform_0, window_bounds = array<i64: 8, 32>}, {transform_indices = @transform_1, window_bounds = array<i64: 8, 32>}, {transform_indices = @transform_2, window_bounds = array<i64: 8, 1>}, {pipeline_mode = #tpu.pipeline_mode<synchronous>, transform_indices = @transform_3, window_bounds = array<i64: 1, 1>}]} {
    %c0_i32 = arith.constant 0 : i32
    %0 = arith.cmpi eq, %arg0, %c0_i32 : i32
    %1 = arith.extui %0 : i1 to i32
    %c0_i32_0 = arith.constant 0 : i32
    %2 = arith.cmpi ne, %1, %c0_i32_0 : i32
    scf.if %2 {
      %cst_17 = arith.constant 0.000000e+00 : f32
      %39 = vector.broadcast %cst_17 : f32 to vector<1x1xf32>
      %c0_18 = arith.constant 0 : index
      %c0_19 = arith.constant 0 : index
      %40 = vector.load %arg5[%c0_18, %c0_19] : memref<1x1xf32, #tpu.memory_space<vmem>>, vector<1x1xf32>
      tpu.vector_store %arg5[%c0_18, %c0_19], %39 {strides = array<i32>} : memref<1x1xf32, #tpu.memory_space<vmem>>, vector<1x1xf32>,
    } else {
    }
    %c0 = arith.constant 0 : index
    %c0_1 = arith.constant 0 : index
    %3 = vector.load %arg1[%c0, %c0_1] : memref<8x32xf32, #tpu.memory_space<vmem>>, vector<8x32xf32>
    %c0_2 = arith.constant 0 : index
    %c0_3 = arith.constant 0 : index
    %4 = vector.load %arg2[%c0_2, %c0_3] : memref<8x32xf32, #tpu.memory_space<vmem>>, vector<8x32xf32>
    %5 = arith.subf %3, %4 : vector<8x32xf32>
    %cst = arith.constant 9.99999997E-7 : f32
    %6 = vector.broadcast %cst : f32 to vector<8x32xf32>
    %7 = arith.addf %5, %6 : vector<8x32xf32>
    %8 = arith.mulf %7, %7 : vector<8x32xf32>
    %cst_4 = arith.constant dense<0.000000e+00> : vector<8xf32>
    %9 = vector.multi_reduction <add>, %8, %cst_4 [1] : vector<8x32xf32> to vector<8xf32>
    %10 = vector.shape_cast %9 : vector<8xf32> to vector<8x1xf32>
    %11 = math.sqrt %10 : vector<8x1xf32>
    %c0_5 = arith.constant 0 : index
    %c0_6 = arith.constant 0 : index
    %12 = vector.load %arg3[%c0_5, %c0_6] : memref<8x1xf32, #tpu.memory_space<vmem>>, vector<8x1xf32>
    %cst_7 = arith.constant 1.000000e+00 : f32
    %13 = vector.broadcast %cst_7 : f32 to vector<8x1xf32>
    %14 = arith.subf %13, %12 : vector<8x1xf32>
    %15 = arith.mulf %14, %10 : vector<8x1xf32>
    %cst_8 = arith.constant 5.000000e-01 : f32
    %16 = vector.broadcast %cst_8 : f32 to vector<8x1xf32>
    %17 = arith.subf %16, %11 : vector<8x1xf32>
    %cst_9 = arith.constant 0.000000e+00 : f32
    %18 = vector.broadcast %cst_9 : f32 to vector<8x1xf32>
    %19 = arith.maximumf %17, %18 : vector<8x1xf32>
    %20 = arith.mulf %19, %19 : vector<8x1xf32>
    %21 = arith.mulf %12, %20 : vector<8x1xf32>
    %22 = arith.addf %15, %21 : vector<8x1xf32>
    %c8_i32 = arith.constant 8 : i32
    %23 = arith.muli %arg0, %c8_i32 : i32
    %24 = tpu.iota {dimensions = array<i32: 0>} : vector<8x1xi32>
    %25 = vector.broadcast %23 : i32 to vector<8x1xi32>
    %26 = arith.addi %25, %24 : vector<8x1xi32>
    %c20_i32 = arith.constant 20 : i32
    %27 = vector.broadcast %c20_i32 : i32 to vector<8x1xi32>
    %28 = arith.cmpi slt, %26, %27 : vector<8x1xi32>
    %cst_10 = arith.constant 0.000000e+00 : f32
    %29 = vector.broadcast %cst_10 : f32 to vector<8x1xf32>
    %30 = arith.select %28, %22, %29 : vector<8x1xi1>, vector<8x1xf32>
    %c0_11 = arith.constant 0 : index
    %c0_12 = arith.constant 0 : index
    %31 = vector.load %arg5[%c0_11, %c0_12] : memref<1x1xf32, #tpu.memory_space<vmem>>, vector<1x1xf32>
    %cst_13 = arith.constant dense<0.000000e+00> : vector<1xf32>
    %32 = vector.multi_reduction <add>, %30, %cst_13 [0] : vector<8x1xf32> to vector<1xf32>
    %33 = vector.shape_cast %32 : vector<1xf32> to vector<1x1xf32>
    %34 = arith.addf %31, %33 : vector<1x1xf32>
    %c0_14 = arith.constant 0 : index
    %c0_15 = arith.constant 0 : index
    %35 = vector.load %arg5[%c0_14, %c0_15] : memref<1x1xf32, #tpu.memory_space<vmem>>, vector<1x1xf32>
    tpu.vector_store %arg5[%c0_14, %c0_15], %34 {strides = array<i32>} : memref<1x1xf32, #tpu.memory_space<vmem>>, vector<1x1xf32>,
    %c2_i32 = arith.constant 2 : i32
    %36 = arith.cmpi eq, %arg0, %c2_i32 : i32
    %37 = arith.extui %36 : i1 to i32
    %c0_i32_16 = arith.constant 0 : i32
    %38 = arith.cmpi ne, %37, %c0_i32_16 : i32
    scf.if %38 {
      %c0_17 = arith.constant 0 : index
      %c0_18 = arith.constant 0 : index
      %39 = vector.load %arg5[%c0_17, %c0_18] : memref<1x1xf32, #tpu.memory_space<vmem>>, vector<1x1xf32>
      %cst_19 = arith.constant 5.000000e-02 : f32
      %40 = vector.broadcast %cst_19 : f32 to vector<1x1xf32>
      %41 = arith.mulf %39, %40 : vector<1x1xf32>
      %c0_20 = arith.constant 0 : index
      %c0_21 = arith.constant 0 : index
      %42 = vector.load %arg4[%c0_20, %c0_21] : memref<1x1xf32, #tpu.memory_space<vmem>>, vector<1x1xf32>
      tpu.vector_store %arg4[%c0_20, %c0_21], %41 {strides = array<i32>} : memref<1x1xf32, #tpu.memory_space<vmem>>, vector<1x1xf32>,
    } else {
    }
    return
  }
  func.func @transform_0(%arg0: i32) -> (i32, i32) {
    %c0_i32 = arith.constant 0 : i32
    %c0_i32_0 = arith.constant 0 : i32
    return %arg0, %c0_i32 : i32, i32
  }
  func.func @transform_1(%arg0: i32) -> (i32, i32) {
    %c0_i32 = arith.constant 0 : i32
    %c0_i32_0 = arith.constant 0 : i32
    return %arg0, %c0_i32 : i32, i32
  }
  func.func @transform_2(%arg0: i32) -> (i32, i32) {
    %c0_i32 = arith.constant 0 : i32
    %c0_i32_0 = arith.constant 0 : i32
    return %arg0, %c0_i32 : i32, i32
  }
  func.func @transform_3(%arg0: i32) -> (i32, i32) {
    %c0_i32 = arith.constant 0 : i32
    %c0_i32_0 = arith.constant 0 : i32
    %c0_i32_1 = arith.constant 0 : i32
    return %c0_i32, %c0_i32_0 : i32, i32
  }
}

</mosaic_0001>

<bundles_post_ra>
// kernel: tpu_custom_call.1
= control target key start
LH: loop header
LB: loop body
LE: loop exit
PB: predicated region body
PF: predicated region fallthrough
CT: control target
= control target key end

     0   :  { %8 = vsyncpa [#allocation4], 0  ;;  %s665_s0 = inlined_call_operand.vmem [shape: f32[20,32], index: 0, kind: input, shape index: {}]   ;;  %s666_s1 = inlined_call_operand.hbm [shape: f32[20,32], index: 1, kind: input, shape index: {}]   ;;  %s667_s2 = inlined_call_operand.vmem [shape: f32[20,1], index: 2, kind: input, shape index: {}]   ;;  %s668_s3 = inlined_call_operand.hbm [shape: f32[1,1], index: 3, kind: output, shape index: {}]  }
   0x1   :  { %10 = vsyncpa [#allocation4 + $0x1], 0 }
   0x2   :  { %11 = vsyncpa [#allocation5], 0  ;;  %s529_s12 = smov 0   ;;  %s531_s13 = smov 0  }
   0x3   :  { %s533_s14 = smov 0   ;;  %s535_s15 = smov 0  }
   0x4 LB: > { %s548_s16 = sadd.s32 4294967295, %s504_s15   ;;  %s551_s17 = sadd.s32 1, %s504_s15   ;;  %s504_s15 = sphi %s535_s15, %s676_s15   ;;  %s500_s14 = sphi %s533_s14, %s675_s14   ;;  %s496_s13 = sphi %s531_s13, %s674_s13   ;;  %s492_s12 = sphi %s529_s12, %s673_s12  }
   0x5   : > { %s47_s18 = ssub.s32 %s504_s15, %s551_s17  ;;  %s50_s19 = sadd.s32 1, %s500_s14 }
   0x6   : > { %p48_p0 = scmp.eq.s32.totalorder %s47_s18, 0  ;;  %p57_p1 = scmp.ne.s32.totalorder %s500_s14, %s496_s13 }
   0x7   : > { %p58_p2 = scmp.eq.s32.totalorder %s504_s15, 0  ;;  %p63_p3 = scmp.ne.s32.totalorder %s496_s13, %s492_s12 }
   0x8   : > { %s561_s20 = scalar_select %p48_p0, %s500_s14, %s50_s19  }
   0x9   : > { %p59_p4 = por %p58_p2, %p57_p1  ;;  %p64_p5 = scmp.eq.s32.totalorder %s548_s16, 0 }
   0xa   : > { %p371_p6 = scmp.lt.s32.totalorder %s504_s15, 3  ;;  %s141_s22 = sand.u32 1, %s500_s14  }
   0xb   : > { %p565_p7 = por %p64_p5, %p63_p3  ;;  %s348_s23 = sshll.u32 %s141_s22, 3 }
   0xc   : > { %s349_s24 = sshll.u32 %s504_s15, 7  ;;  %s145_s28 = scalar_lea.vmem [#allocation3], %s348_s23 }
   0xd   : > { %s574_s27 = scalar_lea.hbm %s666_s1, %s349_s24  ;;  %s152_s29 = sshll.u32 %s145_s28, 4  ;;  %s576_s29 = int_to_ptr.vmem [resolvable:$true] %s152_s29 }
   0xe   : > { %p578_p8 = pnand %p371_p6, %p59_p4  ;;  %s142_s4 = scalar_lea.sflag [#allocation4], %s141_s22 }
   0xf   : > { %s410_s5 = scalar_lea.hbm %s574_s27, 128  ;;  %s415_s8 = scalar_lea.hbm %s666_s1, 384 }
  0x10   : > { %p411_p11 = scmp.ne.s32.totalorder %s574_s27, %s410_s5  ;;  %p412_p12 = pneg %p578_p8 }
  0x11   : > { %p416_p1 = scmp.lt.u32.totalorder %s574_s27, %s666_s1  ;;  %p417_p2 = scmp.lt.u32.totalorder %s415_s8, %s410_s5 }
  0x12   : > { %p413_p13 = pnand %p412_p12, %p411_p11  ;;  %p419_p4 = scmp.lt.u32.totalorder %s410_s5, %s574_s27 }
  0x13   : > { %p418_p3 = por %p417_p2, %p416_p1 }
  0x14   : > { %p414_p0 = pneg %p413_p13 }
  0x15   : > { %p420_p5 = por %p419_p4, %p418_p3 }
  0x17   : > { %p421_p6 = pnand %p420_p5, %p414_p0 }
  0x19   : > { %424 = shalt.err (!%p421_p6)
}
  0x1a   : > { %s425_s11 = scalar_lea.vmem %s576_s29, 128  ;;  %s506_s12 = smov [#allocation3]  }
  0x1b   : > { %p426_p11 = scmp.ne.s32.totalorder %s576_s29, %s425_s11  ;;  %s430_s18 = sshll.u32 %s506_s12, 4  ;;  %s431_s18 = int_to_ptr.vmem [resolvable:$false] %s430_s18 }
  0x1c   : > { %s432_s19 = scalar_lea.vmem %s431_s18, 256  ;;  %p433_p10 = scmp.lt.s32.totalorder %s576_s29, %s431_s18 }
  0x1d   : > { %p428_p13 = pnand %p426_p11, %p412_p12  ;;  %p434_p1 = scmp.lt.s32.totalorder %s432_s19, %s425_s11 }
  0x1f   : > { %p429_p9 = pneg %p428_p13  ;;  %p435_p2 = por %p434_p1, %p433_p10 }
  0x21   : > { %p436_p3 = pnand %p435_p2, %p429_p9 }
  0x23   : > { %439 = shalt.err (!%p436_p3)
}
  0x24   : > { %370 = dma.hbm_to_vmem [thread:$0]  (!%p578_p8), %s574_s27, 128, %s576_s29, %s142_s4  }
  0x25   : > { %p671_p0 = scmp.lt.s32.totalorder %s504_s15, 4  ;;  %p672_p4 = scmp.ge.s32.totalorder %s504_s15, 1 }
  0x27   : > { %p165_p12 = pnand %p672_p4, %p671_p0 }
  0x28   : > { %s170_s22 = sand.u32 (!%p165_p12), 1, %s496_s13  }
  0x29   : > { %168 = sbr.rel (%p165_p12) target bundleno = 287 (0x11f), region = 32  ;;  %s351_s23 = sshll.u32 (!%p165_p12), %s170_s22, 3 }
  0x2a   : > { %s171_s24 = scalar_lea.sflag (!%p165_p12), [#allocation4], %s170_s22  ;;  %s174_s25 = scalar_lea.vmem (!%p165_p12), [#allocation3], %s351_s23 }
  0x30   : > { %483 = dma.done.wait (%p565_p7), %s171_s24, 128  }
  0x31   : > { %485 = vsyncadd (%p565_p7), %s171_s24, 4294967168  ;;  %p200_p9 = scmp.lt.s32.totalorder %s548_s16, 2  ;;  %p354_p8 = scmp.ne.s32.totalorder %s548_s16, 0 }
  0x32   : > { %vm212_vm0 = vcmask (!%p354_p8), 0   ;;  %v507_v0 = vmov (!%p354_p8), 0.0  }
  0x33   : > { %s201_s26 = scalar_select %p200_p9, %s548_s16, 2 }
  0x34   : > { %211 = sbr.rel (%p354_p8) target bundleno = 59 (0x3b), region = 40  ;;  %213 = vst.msk [vmem:[#allocation2] sm:$0x1] (!%p354_p8), %vm212_vm0, %v507_v0 }
  0x35   : > { %s352_s27 = sshll.u32 %s201_s26, 3 }
  0x36   : > { %s203_s29 = scalar_lea.vmem %s665_s0, %s352_s27  ;;  %s207_s5 = scalar_lea.vmem %s667_s2, %s352_s27 }
  0x3b PF: > { %v214_v1 = vld [vmem:[%s203_s29] sm:$0xff]  ;;  %vm219_vm1 = vcmask 261120   ;;  %v239_v9 = vlaneseq  ;;  %s355_s21 = sshll.u32 %s548_s16, 3  ;;  %vm246_vm5 = vcmask 7168   ;;  %vm255_vm6 = vcmask 0   ;;  %p356_p7 = scmp.ne.s32.totalorder %s548_s16, 2 }
  0x3c   : > { %v215_v2 = vld [vmem:[%s174_s25] sm:$0xff]  ;;  %v241_v17 = vstv %s355_s21  ;;  %v245_v32 = vld [vmem:[#allocation2] sm:$0x1] }
  0x3d   : > { %v216_v3 = vsub.f32 %v214_v1, %v215_v2  ;;  %v230_v14 = vld [vmem:[%s207_s5] sm:$0xff]  ;;  %v240_v15 = vshrl.u32 %v239_v9, 7 }
  0x3e   : > { %v231_v18 = vsub.f32 1.0, %v230_v14 }
  0x3f   : > { %v217_v4 = vadd.f32 1e-06, %v216_v3  ;;  %v242_v20 = vadd.s32 %v241_v17, %v240_v15 }
  0x41   : > { %v218_v5 = vmul.f32 %v217_v4, %v217_v4  ;;  %vm243_vm4 = vcmp.lt.s32.totalorder %v242_v20, 20 }
  0x43   : > { %v220_v6 = vsel %vm219_vm1, %v218_v5, 0.0 }
  0x44   : > { %221 = vadd.xlane.f32.xlu0 %v220_v6 }
  0xd1   : > { %v222_v7 = vpop.xlane.xlu0 %221 }
  0xd2   : > { %408 = vrsqrt.f32 %v222_v7  ;;  %vm225_vm2 = vcmp.eq.f32.partialorder %v222_v7, inf  ;;  %v228_v11 = vand.u32 2147483648, %v222_v7  ;;  %vm227_vm3 = vcmp.eq.f32.partialorder %v222_v7, 0.0 }
  0xd3   : > { %v232_v22 = vmul.f32 %v231_v18, %v222_v7 }
  0xdc   : > { %v409_v8 = vpop.eup %408 }
  0xdd   : > { %v224_v10 = vmul.f32 %v409_v8, %v222_v7 }
  0xdf   : > { %v226_v12 = vsel %vm225_vm2, %v222_v7, %v224_v10 }
  0xe0   : > { %v229_v13 = vsel %vm227_vm3, %v228_v11, %v226_v12 }
  0xe1   : > { %v233_v16 = vsub.f32 0.5, %v229_v13 }
  0xe3   : > { %v234_v19 = vmax.f32 %v233_v16, 0.0 }
  0xe5   : > { %v235_v21 = vmul.f32 %v234_v19, %v234_v19 }
  0xe7   : > { %v236_v23 = vmul.f32 %v235_v21, %v230_v14 }
  0xe9   : > { %v237_v24 = vadd.f32 %v236_v23, %v232_v22 }
  0xeb   : > { %v244_v25 = vsel %vm243_vm4, %v237_v24, 0.0 }
  0xec   : > { %v247_v26 = vsel %vm246_vm5, %v244_v25, 0.0 }
  0xed   : > { %v248_v27 = vrot.slane %v247_v26, 4 }
  0xef   : > { %v249_v28 = vadd.f32 %v248_v27, %v247_v26 }
  0xf1   : > { %v250_v29 = vrot.slane %v249_v28, 2 }
  0xf3   : > { %v251_v30 = vadd.f32 %v250_v29, %v249_v28 }
  0xf5   : > { %v252_v31 = vrot.slane %v251_v30, 1  ;;  %260 = sbr.rel (%p356_p7) target bundleno = 262 (0x106), region = 44 }
  0xf7   : > { %v253_v33 = vadd.f32 %v252_v31, %v251_v30 }
  0xf9   : > { %v254_v34 = vadd.f32 %v253_v33, %v245_v32 }
  0xfb   : > { %256 = vst.msk [vmem:[#allocation2] sm:$0x1] %vm255_vm6, %v254_v34 }
 0x102   : > { %v261_v35 = vld [vmem:[#allocation2] sm:$0x1] }
 0x103   : > { %v262_v36 = vmul.f32 0.05, %v261_v35 }
 0x105   : > { %263 = vst.msk [vmem:[#allocation6] sm:$0x1] %vm255_vm6, %v262_v36 }
 0x106 PF: > { %p372_p10 = scmp.eq.s32.totalorder %s548_s16, 2  ;;  %s508_s6 = smov [#allocation6]  }
 0x107   : > { %s271_s7 = sshll.u32 %s508_s6, 4  ;;  %s272_s7 = int_to_ptr.vmem [resolvable:$true] %s271_s7 }
 0x108   : > { %s440_s8 = scalar_lea.vmem %s272_s7, 16  ;;  %s446_s9 = scalar_lea.vmem %s272_s7, 32 }
 0x109   : > { %p441_p5 = scmp.ne.s32.totalorder %s272_s7, %s440_s8  ;;  %p447_p13 = scmp.lt.s32.totalorder %s272_s7, %s272_s7 }
 0x10a   : > { %p448_p1 = scmp.lt.s32.totalorder %s446_s9, %s440_s8 }
 0x10b   : > { %p442_p6 = pnand %p441_p5, %p372_p10 }
 0x10c   : > { %p449_p2 = por %p448_p1, %p447_p13 }
 0x10d   : > { %p443_p11 = pneg %p442_p6 }
 0x10f   : > { %p450_p3 = pnand %p449_p2, %p443_p11 }
 0x111   : > { %453 = shalt.err (!%p450_p3)
}
 0x112   : > { %s454_s12 = scalar_lea.hbm %s668_s3, 16 }
 0x113   : > { %p455_p0 = scmp.ne.s32.totalorder %s668_s3, %s454_s12  ;;  %p460_p9 = scmp.lt.u32.totalorder %s454_s12, %s668_s3 }
 0x115   : > { %p456_p4 = pnand %p455_p0, %p372_p10 }
 0x117   : > { %p457_p12 = pneg %p456_p4 }
 0x119   : > { %p462_p8 = pnand %p460_p9, %p457_p12 }
 0x11b   : > { %465 = shalt.err (!%p462_p8)
}
 0x11c   : > { %364 = dma.vmem_to_hbm [thread:$0]  (%p372_p10), %s272_s7, 16, %s668_s3, [#allocation5]  }
 0x11d   : > { %487 = dma.done.wait (%p372_p10), [#allocation5], 16  }
 0x11e   : > { %489 = vsyncadd (%p372_p10), [#allocation5], 4294967280 }
 0x11f PF: > { %p14_p7 = scmp.ge.s32.totalorder %s551_s17, 5   ;;  %s673_s12 = smov %s496_s13 }
 0x120   : > { %s674_s13 = smov %s500_s14  ;;  %s675_s14 = smov %s561_s20 }
 0x121   : > { %s676_s15 = smov %s551_s17  ;;  %16 = sbr.rel (!%p14_p7) target bundleno = 4 (0x4), region = 83 }
 0x128   :  { %284 = vsyncpa [#allocation4], 1 }
 0x129   :  { %286 = vsyncpa [#allocation4 + $0x1], 1 }
 0x12a   :  { %287 = vsyncpa [#allocation5], 1 }
 0x12b   :  { %289 = vsyncpa [#allocation5 + $0x1], 1 }

</bundles_post_ra>
